<compile_context>
chip_gen: v6e
topology: v6e:2x2x1
jax: 0.10.0
libtpu: 0.0.40
codegen_flags: <defaults>
</compile_context>

<pallas_src>
import numpy as np
import jax
import jax.numpy as jnp
from jax.experimental import pallas as pl
from jax.experimental.pallas import tpu as pltpu


def _round_up(x, m):
    return (x + m - 1) // m * m


def critic_kernel(xs_ref, xat_ref,
                  w1s_ref, w1at_ref, b1_ref,
                  w2_ref, b2_ref, w3_ref, b3_ref, out_ref):
    # Layer 1: dominant (TB,128)@(128,256) contraction, bf16 operands on the
    # MXU with f32 accumulation.  The tiny fused action/action_type block is a
    # single sublane-aligned (TB,8)@(8,256) f32 matmul (negligible work).
    xs = xs_ref[...].astype(w1s_ref.dtype)            # in-kernel cast (VPU, cheap)
    h1 = jnp.dot(xs, w1s_ref[...], preferred_element_type=jnp.float32)
    h1 = h1 + jnp.dot(xat_ref[...], w1at_ref[...],
                      preferred_element_type=jnp.float32)
    h1 = jnp.maximum(h1 + b1_ref[...], 0.0)           # bias + ReLU in f32 (VPU)

    # Layer 2: bf16 operands, f32 accumulation on the MXU.
    h2 = jnp.dot(h1.astype(w2_ref.dtype), w2_ref[...],
                 preferred_element_type=jnp.float32)
    h2 = jnp.maximum(h2 + b2_ref[...], 0.0)

    # Layer 3 (N=1): VPU multiply + cross-lane sum (XLU) instead of a 1-wide
    # MXU matmul (which would waste 127/128 of the MXU pass / result pops).
    q = jnp.sum(h2 * w3_ref[...], axis=-1, keepdims=True) + b3_ref[...]
    out_ref[...] = q.astype(out_ref.dtype)


def critic_forward(state, action, action_type, params, *, block_b=512):
    """state (B,128), action (B,4), action_type (B,3) -> Q (B,1) f32."""
    w1s, w1at, b1, w2, b2, w3r, b3 = params
    B = state.shape[0]
    d_s = w1s.shape[0]
    d_at = w1at.shape[0]          # padded (multiple of 8) action+action_type dim

    # Batch tile: multiple of 16 (bf16 sublane packing); don't over-pad tiny B.
    tb = min(block_b, _round_up(B, 16))
    Bp = _round_up(B, tb)

    # Keep the dominant state stream in its caller dtype (no wrapper-side cast:
    # that would add a full extra HBM pass).  Fuse the tiny action/action_type
    # inputs into one zero-padded f32 block (cheap: 7 columns).
    xs = state.astype(jnp.float32)
    xat = jnp.concatenate([action, action_type], axis=1).astype(jnp.float32)
    if xat.shape[1] < d_at:
        xat = jnp.pad(xat, ((0, 0), (0, d_at - xat.shape[1])))
    if Bp != B:
        pad = ((0, Bp - B), (0, 0))
        xs = jnp.pad(xs, pad)
        xat = jnp.pad(xat, pad)

    grid = (Bp // tb,)
    data_spec = lambda d: pl.BlockSpec((tb, d), lambda i: (i, 0))       # streamed
    res_spec = lambda shape: pl.BlockSpec(shape, lambda i: (0, 0))      # resident

    q = pl.pallas_call(
        critic_kernel,
        out_shape=jax.ShapeDtypeStruct((Bp, 1), jnp.float32),
        grid=grid,
        in_specs=[
            data_spec(d_s), data_spec(d_at),
            res_spec(w1s.shape), res_spec(w1at.shape), res_spec(b1.shape),
            res_spec(w2.shape), res_spec(b2.shape),
            res_spec(w3r.shape), res_spec(b3.shape),
        ],
        out_specs=pl.BlockSpec((tb, 1), lambda i: (i, 0)),
        compiler_params=pltpu.CompilerParams(
            dimension_semantics=("parallel",),   # megacore-shard batch tiles (v7x)
            vmem_limit_bytes=16 * 1024 * 1024),  # right-sized; actual need ~2 MiB
    )(xs, xat, w1s, w1at, b1, w2, b2, w3r, b3)
    return q[:B]


def init_params(key, input_dim=128, n_action=4, n_action_type=3,
                fcl_dims=(256, 256), n_output=1):
    """torch.nn.Linear-style init (uniform +-1/sqrt(fan_in)); weights (in,out)."""
    in0 = input_dim + n_action_type + n_action  # 135
    dims = [(in0, fcl_dims[0]), (fcl_dims[0], fcl_dims[1]), (fcl_dims[1], n_output)]
    params = []
    for fi, fo in dims:
        key, kw, kb = jax.random.split(key, 3)
        bound = 1.0 / np.sqrt(fi)
        w = jax.random.uniform(kw, (fi, fo), jnp.float32, -bound, bound)
        b = jax.random.uniform(kb, (1, fo), jnp.float32, -bound, bound)
        params += [w, b]
    return tuple(params)


def prepare_params(params, input_dim=128, n_action=4, n_action_type=3):
    """Split W1 at the state | [action, action_type] boundary of the torch cat,
    zero-pad the tiny block to a multiple of 8 rows, and cast the two large
    weight matrices to bf16.  Returns (w1s, w1at, b1, w2, b2, w3_row, b3)."""
    w1, b1, w2, b2, w3, b3 = params
    w1s = w1[:input_dim].astype(jnp.bfloat16)                       # (128, 256)
    w1at = w1[input_dim:].astype(jnp.float32)                       # (7, 256)
    k_at = w1at.shape[0]
    k_pad = _round_up(max(k_at, 1), 8)
    if k_pad != k_at:
        w1at = jnp.pad(w1at, ((0, k_pad - k_at), (0, 0)))           # (8, 256)
    w2b = w2.astype(jnp.bfloat16)                                   # (256, 256)
    w3_row = w3.T.astype(jnp.float32)                               # (1, 256)
    return (w1s, w1at, b1.astype(jnp.float32),
            w2b, b2.astype(jnp.float32), w3_row, b3.astype(jnp.float32))


if __name__ == "__main__":
    key = jax.random.PRNGKey(0)
    kp, ks, ka, kt = jax.random.split(key, 4)

    B = 8
    raw_params = init_params(kp)
    params = prepare_params(raw_params)

    state = jax.random.normal(ks, (B, 128), jnp.float32)
    action = jax.random.normal(ka, (B, 4), jnp.float32)
    action_type = jax.random.normal(kt, (B, 3), jnp.float32)

    q = critic_forward(state, action, action_type, params)
    q = jax.block_until_ready(q)
    assert q.shape == (B, 1)

    # Pure-JAX reference with matching precision (bf16 matmuls, f32 accumulation).
    w1s, w1at, b1, w2b, b2, w3r, b3 = params
    xat = jnp.concatenate([action, action_type], axis=1)
    xat = jnp.pad(xat, ((0, 0), (0, w1at.shape[0] - xat.shape[1])))
    h1 = (jnp.dot(state.astype(jnp.bfloat16), w1s, preferred_element_type=jnp.float32)
          + jnp.dot(xat, w1at) + b1)
    h1 = jnp.maximum(h1, 0.0)
    h2 = jnp.maximum(
        jnp.dot(h1.astype(jnp.bfloat16), w2b, preferred_element_type=jnp.float32) + b2,
        0.0)
    ref = jnp.sum(h2 * w3r, axis=-1, keepdims=True) + b3
    np.testing.assert_allclose(np.asarray(q), np.asarray(ref), rtol=2e-2, atol=2e-2)

    # Sanity vs the original full-precision torch math (looser: bf16 weights).
    w1, b1f, w2, b2f, w3, b3f = raw_params
    x = jnp.concatenate([state, action, action_type], axis=1)
    ref32 = jnp.maximum(x @ w1 + b1f, 0.0)
    ref32 = jnp.maximum(ref32 @ w2 + b2f, 0.0)
    ref32 = ref32 @ w3 + b3f
    np.testing.assert_allclose(np.asarray(q), np.asarray(ref32), rtol=1e-1, atol=1e-1)

    print("KERNEL_OK")
</pallas_src>

<mosaic_0001>
module attributes {stable_mosaic.version = 11 : i64} {
  func.func @critic_kernel(%arg0: i32, %arg1: memref<16x128xf32, #tpu.memory_space<vmem>>, %arg2: memref<16x8xf32, #tpu.memory_space<vmem>>, %arg3: memref<128x256xbf16, #tpu.memory_space<vmem>>, %arg4: memref<8x256xf32, #tpu.memory_space<vmem>>, %arg5: memref<1x256xf32, #tpu.memory_space<vmem>>, %arg6: memref<256x256xbf16, #tpu.memory_space<vmem>>, %arg7: memref<1x256xf32, #tpu.memory_space<vmem>>, %arg8: memref<1x256xf32, #tpu.memory_space<vmem>>, %arg9: memref<1x1xf32, #tpu.memory_space<vmem>>, %arg10: memref<16x1xf32, #tpu.memory_space<vmem>>) attributes {dimension_semantics = [#tpu.dimension_semantics<parallel>], iteration_bounds = array<i64: 1>, scalar_prefetch = 0 : i64, scratch_operands = 0 : i64, tpu.core_type = #tpu.core_type<tc>, window_params = [{transform_indices = @transform_0, window_bounds = array<i64: 16, 128>}, {transform_indices = @transform_1, window_bounds = array<i64: 16, 8>}, {pipeline_mode = #tpu.pipeline_mode<synchronous>, transform_indices = @transform_2, window_bounds = array<i64: 128, 256>}, {pipeline_mode = #tpu.pipeline_mode<synchronous>, transform_indices = @transform_3, window_bounds = array<i64: 8, 256>}, {pipeline_mode = #tpu.pipeline_mode<synchronous>, transform_indices = @transform_4, window_bounds = array<i64: 1, 256>}, {pipeline_mode = #tpu.pipeline_mode<synchronous>, transform_indices = @transform_5, window_bounds = array<i64: 256, 256>}, {pipeline_mode = #tpu.pipeline_mode<synchronous>, transform_indices = @transform_6, window_bounds = array<i64: 1, 256>}, {pipeline_mode = #tpu.pipeline_mode<synchronous>, transform_indices = @transform_7, window_bounds = array<i64: 1, 256>}, {pipeline_mode = #tpu.pipeline_mode<synchronous>, transform_indices = @transform_8, window_bounds = array<i64: 1, 1>}, {transform_indices = @transform_9, window_bounds = array<i64: 16, 1>}]} {
    %c0 = arith.constant 0 : index
    %c0_0 = arith.constant 0 : index
    %0 = vector.load %arg1[%c0, %c0_0] : memref<16x128xf32, #tpu.memory_space<vmem>>, vector<16x128xf32>
    %1 = arith.truncf %0 : vector<16x128xf32> to vector<16x128xbf16>
    %c0_1 = arith.constant 0 : index
    %c0_2 = arith.constant 0 : index
    %2 = vector.load %arg3[%c0_1, %c0_2] : memref<128x256xbf16, #tpu.memory_space<vmem>>, vector<128x256xbf16>
    %cst = arith.constant dense<0.000000e+00> : vector<16x256xf32>
    %3 = tpu.matmul %1, %2, %cst {dimension_numbers = #tpu.dot_dimension_numbers<[1], [0], [0], [1], [0, 0, 1, 1], [], []>} : vector<16x128xbf16>, vector<128x256xbf16>, vector<16x256xf32> -> vector<16x256xf32>
    %c0_3 = arith.constant 0 : index
    %c0_4 = arith.constant 0 : index
    %4 = vector.load %arg2[%c0_3, %c0_4] : memref<16x8xf32, #tpu.memory_space<vmem>>, vector<16x8xf32>
    %c0_5 = arith.constant 0 : index
    %c0_6 = arith.constant 0 : index
    %5 = vector.load %arg4[%c0_5, %c0_6] : memref<8x256xf32, #tpu.memory_space<vmem>>, vector<8x256xf32>
    %cst_7 = arith.constant dense<0.000000e+00> : vector<16x256xf32>
    %6 = tpu.matmul %4, %5, %cst_7 {dimension_numbers = #tpu.dot_dimension_numbers<[1], [0], [0], [1], [0, 0, 1, 1], [], []>} : vector<16x8xf32>, vector<8x256xf32>, vector<16x256xf32> -> vector<16x256xf32>
    %7 = arith.addf %3, %6 : vector<16x256xf32>
    %c0_8 = arith.constant 0 : index
    %c0_9 = arith.constant 0 : index
    %8 = vector.load %arg5[%c0_8, %c0_9] : memref<1x256xf32, #tpu.memory_space<vmem>>, vector<1x256xf32>
    %9 = vector.broadcast %8 : vector<1x256xf32> to vector<16x256xf32>
    %10 = arith.addf %7, %9 : vector<16x256xf32>
    %cst_10 = arith.constant 0.000000e+00 : f32
    %11 = vector.broadcast %cst_10 : f32 to vector<16x256xf32>
    %12 = arith.maximumf %10, %11 : vector<16x256xf32>
    %13 = arith.truncf %12 : vector<16x256xf32> to vector<16x256xbf16>
    %c0_11 = arith.constant 0 : index
    %c0_12 = arith.constant 0 : index
    %14 = vector.load %arg6[%c0_11, %c0_12] : memref<256x256xbf16, #tpu.memory_space<vmem>>, vector<256x256xbf16>
    %cst_13 = arith.constant dense<0.000000e+00> : vector<16x256xf32>
    %15 = tpu.matmul %13, %14, %cst_13 {dimension_numbers = #tpu.dot_dimension_numbers<[1], [0], [0], [1], [0, 0, 1, 1], [], []>} : vector<16x256xbf16>, vector<256x256xbf16>, vector<16x256xf32> -> vector<16x256xf32>
    %c0_14 = arith.constant 0 : index
    %c0_15 = arith.constant 0 : index
    %16 = vector.load %arg7[%c0_14, %c0_15] : memref<1x256xf32, #tpu.memory_space<vmem>>, vector<1x256xf32>
    %17 = vector.broadcast %16 : vector<1x256xf32> to vector<16x256xf32>
    %18 = arith.addf %15, %17 : vector<16x256xf32>
    %cst_16 = arith.constant 0.000000e+00 : f32
    %19 = vector.broadcast %cst_16 : f32 to vector<16x256xf32>
    %20 = arith.maximumf %18, %19 : vector<16x256xf32>
    %c0_17 = arith.constant 0 : index
    %c0_18 = arith.constant 0 : index
    %21 = vector.load %arg8[%c0_17, %c0_18] : memref<1x256xf32, #tpu.memory_space<vmem>>, vector<1x256xf32>
    %22 = vector.broadcast %21 : vector<1x256xf32> to vector<16x256xf32>
    %23 = arith.mulf %20, %22 : vector<16x256xf32>
    %cst_19 = arith.constant dense<0.000000e+00> : vector<16xf32>
    %24 = vector.multi_reduction <add>, %23, %cst_19 [1] : vector<16x256xf32> to vector<16xf32>
    %25 = vector.shape_cast %24 : vector<16xf32> to vector<16x1xf32>
    %c0_20 = arith.constant 0 : index
    %c0_21 = arith.constant 0 : index
    %26 = vector.load %arg9[%c0_20, %c0_21] : memref<1x1xf32, #tpu.memory_space<vmem>>, vector<1x1xf32>
    %27 = vector.broadcast %26 : vector<1x1xf32> to vector<16x1xf32>
    %28 = arith.addf %25, %27 : vector<16x1xf32>
    %c0_22 = arith.constant 0 : index
    %c0_23 = arith.constant 0 : index
    %29 = vector.load %arg10[%c0_22, %c0_23] : memref<16x1xf32, #tpu.memory_space<vmem>>, vector<16x1xf32>
    tpu.vector_store %arg10[%c0_22, %c0_23], %28 {strides = array<i32>} : memref<16x1xf32, #tpu.memory_space<vmem>>, vector<16x1xf32>,
    return
  }
  func.func @transform_0(%arg0: i32) -> (i32, i32) {
    %c0_i32 = arith.constant 0 : i32
    %c0_i32_0 = arith.constant 0 : i32
    return %arg0, %c0_i32 : i32, i32
  }
  func.func @transform_1(%arg0: i32) -> (i32, i32) {
    %c0_i32 = arith.constant 0 : i32
    %c0_i32_0 = arith.constant 0 : i32
    return %arg0, %c0_i32 : i32, i32
  }
  func.func @transform_2(%arg0: i32) -> (i32, i32) {
    %c0_i32 = arith.constant 0 : i32
    %c0_i32_0 = arith.constant 0 : i32
    %c0_i32_1 = arith.constant 0 : i32
    return %c0_i32, %c0_i32_0 : i32, i32
  }
  func.func @transform_3(%arg0: i32) -> (i32, i32) {
    %c0_i32 = arith.constant 0 : i32
    %c0_i32_0 = arith.constant 0 : i32
    %c0_i32_1 = arith.constant 0 : i32
    return %c0_i32, %c0_i32_0 : i32, i32
  }
  func.func @transform_4(%arg0: i32) -> (i32, i32) {
    %c0_i32 = arith.constant 0 : i32
    %c0_i32_0 = arith.constant 0 : i32
    %c0_i32_1 = arith.constant 0 : i32
    return %c0_i32, %c0_i32_0 : i32, i32
  }
  func.func @transform_5(%arg0: i32) -> (i32, i32) {
    %c0_i32 = arith.constant 0 : i32
    %c0_i32_0 = arith.constant 0 : i32
    %c0_i32_1 = arith.constant 0 : i32
    return %c0_i32, %c0_i32_0 : i32, i32
  }
  func.func @transform_6(%arg0: i32) -> (i32, i32) {
    %c0_i32 = arith.constant 0 : i32
    %c0_i32_0 = arith.constant 0 : i32
    %c0_i32_1 = arith.constant 0 : i32
    return %c0_i32, %c0_i32_0 : i32, i32
  }
  func.func @transform_7(%arg0: i32) -> (i32, i32) {
    %c0_i32 = arith.constant 0 : i32
    %c0_i32_0 = arith.constant 0 : i32
    %c0_i32_1 = arith.constant 0 : i32
    return %c0_i32, %c0_i32_0 : i32, i32
  }
  func.func @transform_8(%arg0: i32) -> (i32, i32) {
    %c0_i32 = arith.constant 0 : i32
    %c0_i32_0 = arith.constant 0 : i32
    %c0_i32_1 = arith.constant 0 : i32
    return %c0_i32, %c0_i32_0 : i32, i32
  }
  func.func @transform_9(%arg0: i32) -> (i32, i32) {
    %c0_i32 = arith.constant 0 : i32
    %c0_i32_0 = arith.constant 0 : i32
    return %arg0, %c0_i32 : i32, i32
  }
}

</mosaic_0001>

<bundles_post_ra>
// kernel: tpu_custom_call.1
= control target key start
LH: loop header
LB: loop body
LE: loop exit
PB: predicated region body
PF: predicated region fallthrough
CT: control target
= control target key end

     0   :  { %s909_s0 = inlined_call_operand.vmem [shape: f32[16,128], index: 0, kind: input, shape index: {}]   ;;  %s910_s1 = inlined_call_operand.vmem [shape: f32[16,8], index: 1, kind: input, shape index: {}]   ;;  %s911_s2 = inlined_call_operand.hbm [shape: bf16[128,256], index: 2, kind: input, shape index: {}]   ;;  %s912_s3 = inlined_call_operand.hbm [shape: f32[8,256], index: 3, kind: input, shape index: {}]   ;;  %s913_s4 = inlined_call_operand.vmem [shape: f32[1,256], index: 4, kind: input, shape index: {}]   ;;  %s914_s5 = inlined_call_operand.hbm [shape: bf16[256,256], index: 5, kind: input, shape index: {}]   ;;  %s915_s6 = inlined_call_operand.vmem [shape: f32[1,256], index: 6, kind: input, shape index: {}]   ;;  %s916_s7 = inlined_call_operand.vmem [shape: f32[1,256], index: 7, kind: input, shape index: {}]   ;;  %s917_s8 = inlined_call_operand.<no memory space> [shape: f32[1,1], index: 8, kind: input, shape index: {}]   ;;  %s918_s9 = inlined_call_operand.vmem [shape: f32[16,1], index: 9, kind: output, shape index: {}]  }
   0x1   :  { %v14_v0 = vstv %s917_s8 }
   0x2   :  { %15 = vst [vmem:[#allocation2] sm:$0x1] %v14_v0 }
   0x3   :  { %16 = vsyncpa [#allocation4], 0 }
   0x4   :  { %17 = vsyncpa [#allocation6], 0  ;;  %s811_s11 = smov [#allocation5]   ;;  %s812_s13 = smov [#allocation3]  }
   0x5   :  { %s40_s12 = sshll.u32 %s811_s11, 4  ;;  %s27_s14 = sshll.u32 %s812_s13, 4  ;;  %s41_s12 = int_to_ptr.vmem [resolvable:$true] %s40_s12  ;;  %s28_s14 = int_to_ptr.vmem [resolvable:$true] %s27_s14 }
   0x6   :  { %s755_s15 = scalar_lea.vmem %s41_s12, 256  ;;  %p760_p1 = scmp.lt.s32.totalorder %s41_s12, %s41_s12 }
   0x7   :  { %p756_p0 = scmp.ne.s32.totalorder %s41_s12, %s755_s15  ;;  %p761_p2 = scmp.lt.s32.totalorder %s755_s15, %s755_s15 }
   0x9   :  { %p762_p3 = por %p761_p2, %p760_p1 }
   0xb   :  { %p763_p4 = pnand %p762_p3, %p756_p0 }
   0xd   :  { %766 = shalt.err (!%p763_p4)
}
   0xe   :  { %43 = dma.hbm_to_vmem [thread:$0]  %s912_s3, 256, %s41_s12, [#allocation6]  }
   0xf   :  { %s775_s8 = scalar_lea.vmem %s28_s14, 2048  ;;  %p780_p6 = scmp.lt.s32.totalorder %s28_s14, %s28_s14 }
  0x10   :  { %p776_p5 = scmp.ne.s32.totalorder %s28_s14, %s775_s8  ;;  %p781_p7 = scmp.lt.s32.totalorder %s775_s8, %s775_s8 }
  0x12   :  { %p782_p8 = por %p781_p7, %p780_p6 }
  0x14   :  { %p783_p9 = pnand %p782_p8, %p776_p5 }
  0x16   :  { %786 = shalt.err (!%p783_p9)
}
  0x17   :  { %s813_s18 = smov 128   ;;  %s814_s19 = smov 8  }
  0x18   :  { %33 = dma.hbm_to_vmem [thread:$0]  %s911_s2, 2048, %s28_s14, [#allocation4], %s813_s18, %s813_s18, %s814_s19  }
  0x19   :  { %s815_s22 = smov [#allocation7]  }
  0x1a   :  { %s51_s23 = sshll.u32 %s815_s22, 4  ;;  %s52_s23 = int_to_ptr.vmem [resolvable:$true] %s51_s23 }
  0x1b   :  { %s795_s24 = scalar_lea.vmem %s52_s23, 4096  ;;  %p800_p11 = scmp.lt.s32.totalorder %s52_s23, %s52_s23 }
  0x1c   :  { %p796_p10 = scmp.ne.s32.totalorder %s52_s23, %s795_s24  ;;  %p801_p12 = scmp.lt.s32.totalorder %s795_s24, %s795_s24 }
  0x1e   :  { %p802_p13 = por %p801_p12, %p800_p11 }
  0x20   :  { %p803_p0 = pnand %p802_p13, %p796_p10 }
  0x22   :  { %806 = shalt.err (!%p803_p0)
}
  0x23   :  { %57 = dma.hbm_to_vmem [thread:$0]  %s914_s5, 4096, %s52_s23, [#allocation6], %s813_s18, %s813_s18, %s814_s19  }
  0x24   :  { %807 = dma.done.wait [#allocation4], 2048  }
  0x25   :  { %808 = vsyncadd [#allocation4], 4294965248 }
  0x26   :  { %809 = dma.done.wait [#allocation6], 4352  }
  0x27   :  { %810 = vsyncadd [#allocation6], 4294962944  ;;  %v816_v1 = vmov 0.0   ;;  %v96_v2 = vld [vmem:[#allocation5 + $0x8] sm:$0xff]  ;;  %v95_v3 = vld [vmem:[#allocation5] sm:$0xff]  ;;  %vm97_vm0 = vcmask 64512   ;;  %v306_v60 = vlaneseq }
  0x28   :  { %168 = vmatprep.mubr.f32.mxu1 %v816_v1  ;;  %v93_v4 = vld [vmem:[%s910_s1] sm:$0xff]  ;;  %134 = vmatprep.subr.mxu1 %v96_v2  ;;  %v675_v5 = vld [vmem:[#allocation3 + $0x70] ss:$8 sps:$4 sm:$0xff]   ;;  %v94_v12 = vld [vmem:[%s910_s1 + $0x8] sm:$0xff]  ;;  %v817_v15 = vmov 0   ;;  %vm608_vm1 = vcmask 7168  }
  0x29   :  { %135 = vmatpush1.msra.mxu1 %v95_v3  ;;  %v677_v6 = vld [vmem:[#allocation3 + $0x74] ss:$8 sps:$4 sm:$0xff]   ;;  %v680_v7 = vld [vmem:[#allocation3 + $0x64] ss:$8 sps:$4 sm:$0xff]   ;;  %v678_v8 = vld [vmem:[#allocation3 + $0x60] ss:$8 sps:$4 sm:$0xff]  }
  0x2a   :  { %617 = vmatmul.mubr.msk.f32.vlgmr.msra.gmra.mxu1 %vm97_vm0, %v93_v4  ;;  %261 = vmatprep.subr.bf16.mxu1 %v677_v6  ;;  %v683_v9 = vld [vmem:[#allocation3 + $0x54] ss:$8 sps:$4 sm:$0xff]   ;;  %v681_v10 = vld [vmem:[#allocation3 + $0x50] ss:$8 sps:$4 sm:$0xff]   ;;  %v686_v11 = vld [vmem:[#allocation3 + $0x44] ss:$8 sps:$4 sm:$0xff]  }
  0x2b   :  { %174 = vmatprep.mubr.f32.mxu1 %v816_v1  ;;  %262 = vmatpush1.bf16.msra.mxu1 %v675_v5  ;;  %v684_v13 = vld [vmem:[#allocation3 + $0x40] ss:$8 sps:$4 sm:$0xff]   ;;  %v689_v14 = vld [vmem:[#allocation3 + $0x34] ss:$8 sps:$4 sm:$0xff]   ;;  %v699_v16 = vld [vmem:[#allocation7 + $0x74] ss:$8 sps:$4 sm:$0xff]  }
  0x2c   :  { %263 = vmatprep.subr.bf16.mxu1 %v680_v7  ;;  %v701_v17 = vld [vmem:[#allocation7 + $0x70] ss:$8 sps:$4 sm:$0xff]   ;;  %v702_v18 = vld [vmem:[#allocation7 + $0x64] ss:$8 sps:$4 sm:$0xff]   ;;  %530 = vmatprep.subr.bf16.mxu0 %v699_v16  ;;  %v687_v19 = vld [vmem:[#allocation3 + $0x30] ss:$8 sps:$4 sm:$0xff]  }
  0x2d   :  { %531 = vmatpush1.bf16.msra.mxu0 %v701_v17  ;;  %v704_v20 = vld [vmem:[#allocation7 + $0x60] ss:$8 sps:$4 sm:$0xff]   ;;  %v692_v21 = vld [vmem:[#allocation3 + $0x24] ss:$8 sps:$4 sm:$0xff]   ;;  %v707_v23 = vld [vmem:[#allocation7 + $0x50] ss:$8 sps:$4 sm:$0xff]  }
  0x2e   :  { %618 = vmatmul.mubr.msk.f32.gmra.mxu1 %vm97_vm0, %v94_v12  ;;  %532 = vmatprep.subr.bf16.mxu0 %v702_v18  ;;  %v705_v22 = vld [vmem:[#allocation7 + $0x54] ss:$8 sps:$4 sm:$0xff]   ;;  %v690_v24 = vld [vmem:[#allocation3 + $0x20] ss:$8 sps:$4 sm:$0xff]   ;;  %v708_v25 = vld [vmem:[#allocation7 + $0x44] ss:$8 sps:$4 sm:$0xff]  }
  0x2f   :  { %264 = vmatpush1.bf16.msra.mxu1 %v678_v8  ;;  %293 = vmatprep.mubr.bf16.mxu1 %v817_v15  ;;  %v695_v26 = vld [vmem:[#allocation3 + $0x14] ss:$8 sps:$4 sm:$0xff]   ;;  %v710_v27 = vld [vmem:[#allocation7 + $0x40] ss:$8 sps:$4 sm:$0xff]   ;;  %v698_v29 = vld [vmem:[#allocation3 + $0x4] ss:$8 sps:$4 sm:$0xff]  }
  0x30   :  { %265 = vmatprep.subr.bf16.mxu1 %v683_v9  ;;  %v693_v28 = vld [vmem:[#allocation3 + $0x10] ss:$8 sps:$4 sm:$0xff]   ;;  %v696_v30 = vld [vmem:[#allocation3] ss:$8 sps:$4 sm:$0xff]   ;;  %v711_v34 = vld [vmem:[#allocation7 + $0x34] ss:$8 sps:$4 sm:$0xff]  }
  0x31   :  { %533 = vmatpush1.bf16.msra.mxu0 %v704_v20  ;;  %v74_v31 = vld [vmem:[%s909_s0] sm:$0xff]  ;;  %v75_v32 = vld [vmem:[%s909_s0 + $0x8] sm:$0xff]  ;;  %v716_v37 = vld [vmem:[#allocation7 + $0x20] ss:$8 sps:$4 sm:$0xff]   ;;  %v307_v62 = vshrl.u32 %v306_v60, 7 }
  0x32   :  { %534 = vmatprep.subr.bf16.mxu0 %v705_v22  ;;  %v76_v33 = vpack.c.bf16 %v75_v32, %v74_v31  ;;  %v713_v35 = vld [vmem:[#allocation7 + $0x30] ss:$8 sps:$4 sm:$0xff]   ;;  %v714_v36 = vld [vmem:[#allocation7 + $0x24] ss:$8 sps:$4 sm:$0xff]   ;;  %v717_v38 = vld [vmem:[#allocation7 + $0x14] ss:$8 sps:$4 sm:$0xff]  }
  0x33   :  { %266 = vmatpush1.bf16.msra.mxu1 %v681_v10  ;;  %v719_v39 = vld [vmem:[#allocation7 + $0x10] ss:$8 sps:$4 sm:$0xff]   ;;  %v720_v40 = vld [vmem:[#allocation7 + $0x4] ss:$8 sps:$4 sm:$0xff]   ;;  %v722_v41 = vld [vmem:[#allocation7] ss:$8 sps:$4 sm:$0xff]  }
  0x34   :  { %267 = vmatprep.subr.bf16.mxu1 %v686_v11  ;;  %v723_v42 = vld [vmem:[#allocation7 + $0xf4] ss:$8 sps:$4 sm:$0xff]   ;;  %v725_v43 = vld [vmem:[#allocation7 + $0xf0] ss:$8 sps:$4 sm:$0xff]   ;;  %v726_v44 = vld [vmem:[#allocation7 + $0xe4] ss:$8 sps:$4 sm:$0xff]  }
  0x35   :  { %535 = vmatpush1.bf16.msra.mxu0 %v707_v23  ;;  %v728_v45 = vld [vmem:[#allocation7 + $0xe0] ss:$8 sps:$4 sm:$0xff]   ;;  %v729_v46 = vld [vmem:[#allocation7 + $0xd4] ss:$8 sps:$4 sm:$0xff]   ;;  %v731_v47 = vld [vmem:[#allocation7 + $0xd0] ss:$8 sps:$4 sm:$0xff]  }
  0x36   :  { %536 = vmatprep.subr.bf16.mxu0 %v708_v25  ;;  %v732_v48 = vld [vmem:[#allocation7 + $0xc4] ss:$8 sps:$4 sm:$0xff]   ;;  %v734_v49 = vld [vmem:[#allocation7 + $0xc0] ss:$8 sps:$4 sm:$0xff]   ;;  %v735_v50 = vld [vmem:[#allocation7 + $0xb4] ss:$8 sps:$4 sm:$0xff]  }
  0x37   :  { %268 = vmatpush1.bf16.msra.mxu1 %v684_v13  ;;  %v737_v51 = vld [vmem:[#allocation7 + $0xb0] ss:$8 sps:$4 sm:$0xff]   ;;  %v738_v52 = vld [vmem:[#allocation7 + $0xa4] ss:$8 sps:$4 sm:$0xff]   ;;  %v740_v53 = vld [vmem:[#allocation7 + $0xa0] ss:$8 sps:$4 sm:$0xff]  }
  0x38   :  { %269 = vmatprep.subr.bf16.mxu1 %v689_v14  ;;  %v741_v54 = vld [vmem:[#allocation7 + $0x94] ss:$8 sps:$4 sm:$0xff]   ;;  %v743_v55 = vld [vmem:[#allocation7 + $0x90] ss:$8 sps:$4 sm:$0xff]   ;;  %v744_v56 = vld [vmem:[#allocation7 + $0x84] ss:$8 sps:$4 sm:$0xff]  }
  0x39   :  { %537 = vmatpush1.bf16.msra.mxu0 %v710_v27  ;;  %v746_v57 = vld [vmem:[#allocation7 + $0x80] ss:$8 sps:$4 sm:$0xff]   ;;  %v312_v0 = vsub.s32 1, %v307_v62  ;;  %v308_v2 = vsub.s32 0, %v307_v62  ;;  %v304_v3 = vld [vmem:[%s913_s4] sm:$0x3] }
  0x3a   :  { %538 = vmatprep.subr.bf16.mxu0 %v711_v34  ;;  %v358_v23 = vld [vmem:[%s915_s6] sm:$0x3] }
  0x3b   :  { %270 = vmatpush1.bf16.msra.mxu1 %v687_v19  ;;  %v313_v6 = vrot.slane %v304_v3, %v312_v0  ;;  %v309_v8 = vrot.slane %v304_v3, %v308_v2  ;;  %v367_v25 = vrot.slane %v358_v23, %v312_v0  ;;  %v577_v27 = vld [vmem:[%s916_s7] sm:$0x3] }
  0x3c   :  { %271 = vmatprep.subr.bf16.mxu1 %v692_v21  ;;  %v582_v32 = vrot.slane %v577_v27, %v308_v2 }
  0x3d   :  { %539 = vmatpush1.bf16.msra.mxu0 %v713_v35 }
  0x3e   :  { %540 = vmatprep.subr.bf16.mxu0 %v714_v36 }
  0x3f   :  { %272 = vmatpush1.bf16.msra.mxu1 %v690_v24  ;;  %v363_v24 = vrot.slane %v358_v23, %v308_v2 }
  0x40   :  { %273 = vmatprep.subr.bf16.mxu1 %v695_v26 }
  0x41   :  { %541 = vmatpush1.bf16.msra.mxu0 %v716_v37 }
  0x42   :  { %542 = vmatprep.subr.bf16.mxu0 %v717_v38 }
  0x43   :  { %274 = vmatpush1.bf16.msra.mxu1 %v693_v28 }
  0x44   :  { %275 = vmatprep.subr.bf16.mxu1 %v698_v29 }
  0x45   :  { %543 = vmatpush1.bf16.msra.mxu0 %v719_v39 }
  0x46   :  { %544 = vmatprep.subr.bf16.mxu0 %v720_v40 }
  0x47   :  { %276 = vmatpush1.bf16.msra.mxu1 %v696_v30 }
  0x49   :  { %545 = vmatpush1.bf16.msra.mxu0 %v722_v41 }
  0x4a   :  { %294 = vmatmul.mubr.bf16.vlgmr.msra.gmra.mxu1 %v76_v33  ;;  %546 = vmatprep.subr.bf16.mxu0 %v723_v42  ;;  %v586_v33 = vrot.slane %v577_v27, %v312_v0 }
  0x4d   :  { %547 = vmatpush2.bf16.msra.mxu0 %v725_v43 }
  0x4e   :  { %548 = vmatprep.subr.bf16.mxu0 %v726_v44 }
  0x51   :  { %549 = vmatpush2.bf16.msra.mxu0 %v728_v45 }
  0x52   :  { %550 = vmatprep.subr.bf16.mxu0 %v729_v46 }
  0x55   :  { %551 = vmatpush2.bf16.msra.mxu0 %v731_v47  ;;  %v667_v47 = vld [vmem:[#allocation2] ss:$0 sm:$0xff] }
  0x56   :  { %552 = vmatprep.subr.bf16.mxu0 %v732_v48 }
  0x59   :  { %553 = vmatpush2.bf16.msra.mxu0 %v734_v49 }
  0x5a   :  { %554 = vmatprep.subr.bf16.mxu0 %v735_v50 }
  0x5d   :  { %555 = vmatpush2.bf16.msra.mxu0 %v737_v51 }
  0x5e   :  { %556 = vmatprep.subr.bf16.mxu0 %v738_v52 }
  0x61   :  { %557 = vmatpush2.bf16.msra.mxu0 %v740_v53 }
  0x62   :  { %558 = vmatprep.subr.bf16.mxu0 %v741_v54 }
  0x65   :  { %559 = vmatpush2.bf16.msra.mxu0 %v743_v55 }
  0x66   :  { %560 = vmatprep.subr.bf16.mxu0 %v744_v56 }
  0x69   :  { %561 = vmatpush2.bf16.msra.mxu0 %v746_v57 }
  0xea   :  { %v170_v58 = vpop.f32.mrf.mxu1 }
  0xec   :  { %v172_v59 = vpop.f32.mrf.mxu1 }
  0xee   :  { %v176_v61 = vpop.f32.mrf.mxu1 }
  0xf0   :  { %v178_v63 = vpop.f32.mrf.mxu1 }
 0x10a   :  { %v295_v1 = vpop.f32.mrf.mxu1 }
 0x10b   :  { %v296_v7 = vadd.f32 %v295_v1, %v170_v58 }
 0x10c   :  { %v297_v4 = vpop.f32.mrf.mxu1 }
 0x10d   :  { %v298_v5 = vadd.f32 %v297_v4, %v172_v59  ;;  %v316_v15 = vadd.f32 %v309_v8, %v296_v7 }
 0x10e   :  { %v299_v9 = vpop.f32.mrf.mxu1 }
 0x10f   :  { %v300_v10 = vadd.f32 %v299_v9, %v176_v61  ;;  %v317_v14 = vadd.f32 %v313_v6, %v298_v5  ;;  %v320_v20 = vmax.f32 %v316_v15, 0.0 }
 0x110   :  { %v301_v11 = vpop.f32.mrf.mxu1 }
 0x111   :  { %v318_v12 = vadd.f32 %v309_v8, %v300_v10  ;;  %v302_v13 = vadd.f32 %v301_v11, %v178_v63  ;;  %v321_v18 = vmax.f32 %v317_v14, 0.0 }
 0x113   :  { %v319_v16 = vadd.f32 %v313_v6, %v302_v13  ;;  %v322_v17 = vmax.f32 %v318_v12, 0.0 }
 0x115   :  { %v323_v19 = vmax.f32 %v319_v16, 0.0  ;;  %v324_v22 = vpack.c.bf16 %v322_v17, %v320_v20 }
 0x117   :  { %v325_v21 = vpack.c.bf16 %v323_v19, %v321_v18 }
 0x119   :  { %562 = vmatprep.mubr.bf16.mxu0 %v325_v21 }
 0x11a   :  { %563 = vmatmul.mubr.bf16.vlgmr.msra.gmra.mxu0 %v324_v22 }
 0x1da   :  { %v564_v26 = vpop.f32.mrf.mxu0 }
 0x1db   :  { %v565_v28 = vadd.f32 %v564_v26, %v363_v24 }
 0x1dc   :  { %v566_v29 = vpop.f32.mrf.mxu0 }
 0x1dd   :  { %v573_v30 = vmax.f32 %v565_v28, 0.0  ;;  %v567_v31 = vadd.f32 %v566_v29, %v367_v25 }
 0x1de   :  { %v568_v34 = vpop.f32.mrf.mxu0 }
 0x1df   :  { %v574_v35 = vmax.f32 %v567_v31, 0.0  ;;  %v569_v36 = vadd.f32 %v568_v34, %v363_v24  ;;  %v589_v40 = vmul.f32 %v582_v32, %v573_v30 }
 0x1e0   :  { %v570_v37 = vpop.f32.mrf.mxu0 }
 0x1e1   :  { %v575_v38 = vmax.f32 %v569_v36, 0.0  ;;  %v571_v39 = vadd.f32 %v570_v37, %v367_v25  ;;  %v590_v41 = vmul.f32 %v586_v33, %v574_v35 }
 0x1e3   :  { %v576_v42 = vmax.f32 %v571_v39, 0.0  ;;  %v593_v43 = vadd.f32 %v590_v41, %v589_v40  ;;  %v591_v44 = vmul.f32 %v582_v32, %v575_v38 }
 0x1e5   :  { %v592_v45 = vmul.f32 %v586_v33, %v576_v42  ;;  %594 = vadd.xlane.f32.xlu0 %v593_v43 }
 0x1e7   :  { %v596_v46 = vadd.f32 %v592_v45, %v591_v44 }
 0x1e9   :  { %597 = vadd.xlane.f32.xlu0 %v596_v46 }
 0x26e   :  { %v595_v48 = vpop.xlane.xlu0 %594 }
 0x26f   :  { %v606_v49 = vadd.f32 %v667_v47, %v595_v48 }
 0x271   :  { %609 = vst.msk [vmem:[%s918_s9] sm:$0xff] %vm608_vm1, %v606_v49 }
 0x272   :  { %v598_v50 = vpop.xlane.xlu0 %597 }
 0x273   :  { %v607_v51 = vadd.f32 %v667_v47, %v598_v50 }
 0x275   :  { %610 = vst.msk [vmem:[%s918_s9 + $0x8] sm:$0xff] %vm608_vm1, %v607_v51 }
 0x276   :  { %615 = vsyncpa [#allocation4], 1 }
 0x277   :  { %616 = vsyncpa [#allocation6], 1 }

</bundles_post_ra>
